<compile_context>
chip_gen: v6e
topology: v6e:2x2x1
jax: 0.10.0
libtpu: 0.0.40
codegen_flags: <defaults>
</compile_context>

<pallas_src>
import functools

import jax
import jax.numpy as jnp
from jax import lax
from jax.experimental import pallas as pl
from jax.experimental.pallas import tpu as pltpu

EPS = 1e-5
LANE = 128
SUB = 8
VMEM_LIMIT_BYTES = 32 * 1024 * 1024


def _round_up(x, m):
    return ((x + m - 1) // m) * m


def conv_bn_relu(x_nchw, weight, bias, gamma, beta, *, stride=1, padding=1,
                 tile_p=2048):
    """Conv2d(K, stride, padding) -> BatchNorm2d (training batch stats) -> ReLU.

    x_nchw: (N, C_in, H, W); weight: (C_out, C_in, K, K).  Returns NCHW f32.
    """
    # Training-mode BN subtracts the per-channel batch mean, which cancels a
    # constant conv bias exactly -> skip the add (saves a VPU pass + one DMA).
    del bias

    N, C_in, H, W = x_nchw.shape
    C_out, _, KH, KW = weight.shape
    H_out = (H + 2 * padding - KH) // stride + 1
    W_out = (W + 2 * padding - KW) // stride + 1
    P = N * H_out * W_out
    CKK = KH * KW * C_in

    # ---- glue: im2col built directly in channel-on-sublane (CKK, P) order ---
    # TODO(synk): for large inputs replace the K*K im2col expansion with an
    # in-kernel shifted-matmul accumulation over row tiles (+halo) so each
    # input element is read from HBM once instead of K*K times.
    xt = jnp.transpose(x_nchw, (1, 0, 2, 3))                    # (C_in, N, H, W)
    xp = jnp.pad(xt, ((0, 0), (0, 0), (padding, padding), (padding, padding)))
    slabs = [
        xp[:, :, kh:kh + (H_out - 1) * stride + 1:stride,
                 kw:kw + (W_out - 1) * stride + 1:stride]
        for kh in range(KH) for kw in range(KW)
    ]                                                            # (C_in, N, Ho, Wo)
    patches = jnp.stack(slabs, axis=0).reshape(CKK, P)           # (CKK, P)

    # Round the contraction dim up to the bf16 sublane tile (16) only; XLA's
    # tiled layout pads those sublanes anyway, so this adds ~no HBM bytes and
    # keeps the MXU contraction aligned.  The pixel axis stays un-padded.
    CKK_pad = _round_up(CKK, 16)
    if CKK_pad != CKK:
        patches = jnp.pad(patches, ((0, CKK_pad - CKK), (0, 0)))
    patches = patches.astype(jnp.bfloat16)

    COUT_SUB = _round_up(C_out, SUB)                             # channels on sublanes
    w2 = jnp.transpose(weight, (0, 2, 3, 1)).reshape(C_out, CKK)  # matches patch order
    w_b = jnp.zeros((COUT_SUB, CKK_pad), jnp.bfloat16).at[:C_out, :CKK].set(
        w2.astype(jnp.bfloat16))
    gamma2 = jnp.zeros((COUT_SUB, 1), jnp.float32).at[:C_out, 0].set(gamma)
    beta2 = jnp.zeros((COUT_SUB, 1), jnp.float32).at[:C_out, 0].set(beta)

    tile_p = _round_up(max(LANE, min(tile_p, _round_up(P, LANE))), LANE)
    num_tiles = pl.cdiv(P, tile_p)
    divisible = (num_tiles * tile_p == P)
    n_first = min(tile_p, P)                # valid pixels in the first tile
    inv_cnt = 1.0 / float(P)

    def _mask_cols(v, i):
        # zero out lanes beyond P in a partial last tile (no-op if divisible)
        if divisible:
            return v
        col = lax.broadcasted_iota(jnp.int32, v.shape, 1) + i * tile_p
        return jnp.where(col < P, v, 0.0)

    # ---- fused kernel: phase 0 -> batch stats, phase 1 -> normalize + ReLU --
    def kernel(x_ref, w_ref, g_ref, b_ref, o_ref,
               c0_ref, sum_ref, ssq_ref, scale_ref, shift_ref):
        p = pl.program_id(0)      # phase
        i = pl.program_id(1)      # pixel-tile index

        # (COUT_SUB, tile_p) f32 conv tile; recomputed in both phases.
        conv = jnp.dot(w_ref[...], x_ref[...],
                       preferred_element_type=jnp.float32)

        @pl.when((p == 0) & (i == 0))
        def _init():
            # pilot per-channel offset (first-tile mean) stabilizes the
            # E[x^2] - mean^2 variance computation.
            c0_ref[...] = jnp.sum(_mask_cols(conv, i), axis=1,
                                  keepdims=True) * (1.0 / float(n_first))
            sum_ref[...] = jnp.zeros_like(sum_ref)
            ssq_ref[...] = jnp.zeros_like(ssq_ref)

        @pl.when(p == 0)
        def _stats():
            d = _mask_cols(conv - c0_ref[...], i)
            sum_ref[...] += jnp.sum(d, axis=1, keepdims=True)
            ssq_ref[...] += jnp.sum(d * d, axis=1, keepdims=True)

        @pl.when((p == 1) & (i == 0))
        def _finalize():
            m1 = sum_ref[...] * inv_cnt                    # E[conv - c0]
            mean = c0_ref[...] + m1
            var = jnp.maximum(ssq_ref[...] * inv_cnt - m1 * m1, 0.0)
            scale = g_ref[...] * lax.rsqrt(var + EPS)
            scale_ref[...] = scale
            shift_ref[...] = b_ref[...] - mean * scale

        @pl.when(p == 1)
        def _normalize():
            y = conv * scale_ref[...] + shift_ref[...]
            o_ref[...] = jnp.maximum(y, 0.0).astype(o_ref.dtype)

    cost = pl.CostEstimate(
        flops=2 * 2 * P * CKK_pad * COUT_SUB,                     # matmul in both phases
        transcendentals=COUT_SUB,
        bytes_accessed=int(2 * patches.size * 2 + w_b.size * 2
                           + COUT_SUB * P * 4 + 4 * COUT_SUB * 4),
    )

    out_cp = pl.pallas_call(
        kernel,
        out_shape=jax.ShapeDtypeStruct((COUT_SUB, P), jnp.float32),
        grid=(2, num_tiles),
        in_specs=[
            pl.BlockSpec((CKK_pad, tile_p), lambda p, i: (0, i)),    # patches (streamed)
            pl.BlockSpec((COUT_SUB, CKK_pad), lambda p, i: (0, 0)),  # weight (resident)
            pl.BlockSpec((COUT_SUB, 1), lambda p, i: (0, 0)),        # gamma  (resident)
            pl.BlockSpec((COUT_SUB, 1), lambda p, i: (0, 0)),        # beta   (resident)
        ],
        # Output block pinned at 0 during the stats phase (no writeback), then
        # streams block i during the normalize phase -> one output write pass.
        out_specs=pl.BlockSpec((COUT_SUB, tile_p), lambda p, i: (0, i * p)),
        scratch_shapes=[pltpu.VMEM((COUT_SUB, 1), jnp.float32)] * 5,
        compiler_params=pltpu.CompilerParams(
            dimension_semantics=("arbitrary", "arbitrary"),
            vmem_limit_bytes=VMEM_LIMIT_BYTES,
        ),
        cost_estimate=cost,
    )(patches, w_b, gamma2, beta2)

    out = out_cp[:C_out, :].reshape(C_out, N, H_out, W_out)
    return jnp.transpose(out, (1, 0, 2, 3))


def _reference(x_nchw, weight, bias, gamma, beta, *, stride=1, padding=1):
    """Pure-JAX f32 reference: conv (with bias) + training-mode BN + ReLU."""
    conv = lax.conv_general_dilated(
        x_nchw, weight, window_strides=(stride, stride),
        padding=((padding, padding), (padding, padding)),
        dimension_numbers=("NCHW", "OIHW", "NCHW"),
    ) + bias[None, :, None, None]
    mean = jnp.mean(conv, axis=(0, 2, 3), keepdims=True)
    var = jnp.mean((conv - mean) ** 2, axis=(0, 2, 3), keepdims=True)
    xhat = (conv - mean) * lax.rsqrt(var + EPS)
    y = xhat * gamma[None, :, None, None] + beta[None, :, None, None]
    return jnp.maximum(y, 0.0)


if __name__ == "__main__":
    key = jax.random.PRNGKey(0)
    k_x, k_w, k_b = jax.random.split(key, 3)

    N, C_in, H, W = 2, 4, 16, 16
    C_out, K = 8, 3

    x = jax.random.normal(k_x, (N, C_in, H, W), dtype=jnp.float32)
    weight = jax.random.normal(k_w, (C_out, C_in, K, K), dtype=jnp.float32) * 0.1
    bias = jax.random.normal(k_b, (C_out,), dtype=jnp.float32) * 0.1
    gamma = jnp.ones((C_out,), dtype=jnp.float32)   # BatchNorm2d weight init
    beta = jnp.zeros((C_out,), dtype=jnp.float32)   # BatchNorm2d bias init

    # small tile so the test exercises the multi-tile pipelined path
    # (P = 512 pixels -> 4 row tiles x 2 phases = 8 grid steps)
    fn = jax.jit(functools.partial(conv_bn_relu, tile_p=128))
    out = fn(x, weight, bias, gamma, beta)
    jax.block_until_ready(out)

    ref = _reference(x, weight, bias, gamma, beta)
    assert out.shape == (N, C_out, H, W)
    # bf16 MXU operands (f32 accumulation) -> compare at bf16-level tolerance
    assert jnp.allclose(out, ref, rtol=2e-2, atol=3e-2), "mismatch vs reference"

    print("KERNEL_OK")
</pallas_src>

<mosaic_0001>
module attributes {stable_mosaic.version = 11 : i64} {
  func.func @kernel(%arg0: i32, %arg1: i32, %arg2: memref<48x128xbf16, #tpu.memory_space<vmem>>, %arg3: memref<8x48xbf16, #tpu.memory_space<vmem>>, %arg4: memref<8x1xf32, #tpu.memory_space<vmem>>, %arg5: memref<8x1xf32, #tpu.memory_space<vmem>>, %arg6: memref<8x128xf32, #tpu.memory_space<vmem>>, %arg7: memref<8x1xf32, #tpu.memory_space<vmem>>, %arg8: memref<8x1xf32, #tpu.memory_space<vmem>>, %arg9: memref<8x1xf32, #tpu.memory_space<vmem>>, %arg10: memref<8x1xf32, #tpu.memory_space<vmem>>, %arg11: memref<8x1xf32, #tpu.memory_space<vmem>>) attributes {dimension_semantics = [#tpu.dimension_semantics<arbitrary>, #tpu.dimension_semantics<arbitrary>], iteration_bounds = array<i64: 2, 4>, scalar_prefetch = 0 : i64, scratch_operands = 5 : i64, tpu.core_type = #tpu.core_type<tc>, window_params = [{transform_indices = @transform_0, window_bounds = array<i64: 48, 128>}, {pipeline_mode = #tpu.pipeline_mode<synchronous>, transform_indices = @transform_1, window_bounds = array<i64: 8, 48>}, {pipeline_mode = #tpu.pipeline_mode<synchronous>, transform_indices = @transform_2, window_bounds = array<i64: 8, 1>}, {pipeline_mode = #tpu.pipeline_mode<synchronous>, transform_indices = @transform_3, window_bounds = array<i64: 8, 1>}, {transform_indices = @transform_4, window_bounds = array<i64: 8, 128>}]} {
    %c0 = arith.constant 0 : index
    %c0_0 = arith.constant 0 : index
    %0 = vector.load %arg3[%c0, %c0_0] : memref<8x48xbf16, #tpu.memory_space<vmem>>, vector<8x48xbf16>
    %c0_1 = arith.constant 0 : index
    %c0_2 = arith.constant 0 : index
    %1 = vector.load %arg2[%c0_1, %c0_2] : memref<48x128xbf16, #tpu.memory_space<vmem>>, vector<48x128xbf16>
    %cst = arith.constant dense<0.000000e+00> : vector<8x128xf32>
    %2 = tpu.matmul %0, %1, %cst {dimension_numbers = #tpu.dot_dimension_numbers<[1], [0], [0], [1], [0, 0, 1, 1], [], []>} : vector<8x48xbf16>, vector<48x128xbf16>, vector<8x128xf32> -> vector<8x128xf32>
    %c0_i32 = arith.constant 0 : i32
    %3 = arith.cmpi eq, %arg0, %c0_i32 : i32
    %c0_i32_3 = arith.constant 0 : i32
    %4 = arith.cmpi eq, %arg1, %c0_i32_3 : i32
    %5 = arith.andi %3, %4 : i1
    %6 = arith.extui %5 : i1 to i32
    %c0_i32_4 = arith.constant 0 : i32
    %7 = arith.cmpi ne, %6, %c0_i32_4 : i32
    scf.if %7 {
      %cst_11 = arith.constant dense<0.000000e+00> : vector<8xf32>
      %19 = vector.multi_reduction <add>, %2, %cst_11 [1] : vector<8x128xf32> to vector<8xf32>
      %20 = vector.shape_cast %19 : vector<8xf32> to vector<8x1xf32>
      %cst_12 = arith.constant 7.812500e-03 : f32
      %21 = vector.broadcast %cst_12 : f32 to vector<8x1xf32>
      %22 = arith.mulf %20, %21 : vector<8x1xf32>
      %c0_13 = arith.constant 0 : index
      %c0_14 = arith.constant 0 : index
      %23 = vector.load %arg7[%c0_13, %c0_14] : memref<8x1xf32, #tpu.memory_space<vmem>>, vector<8x1xf32>
      tpu.vector_store %arg7[%c0_13, %c0_14], %22 {strides = array<i32>} : memref<8x1xf32, #tpu.memory_space<vmem>>, vector<8x1xf32>,
      %cst_15 = arith.constant 0.000000e+00 : f32
      %24 = vector.broadcast %cst_15 : f32 to vector<8x1xf32>
      %c0_16 = arith.constant 0 : index
      %c0_17 = arith.constant 0 : index
      %25 = vector.load %arg8[%c0_16, %c0_17] : memref<8x1xf32, #tpu.memory_space<vmem>>, vector<8x1xf32>
      tpu.vector_store %arg8[%c0_16, %c0_17], %24 {strides = array<i32>} : memref<8x1xf32, #tpu.memory_space<vmem>>, vector<8x1xf32>,
      %cst_18 = arith.constant 0.000000e+00 : f32
      %26 = vector.broadcast %cst_18 : f32 to vector<8x1xf32>
      %c0_19 = arith.constant 0 : index
      %c0_20 = arith.constant 0 : index
      %27 = vector.load %arg9[%c0_19, %c0_20] : memref<8x1xf32, #tpu.memory_space<vmem>>, vector<8x1xf32>
      tpu.vector_store %arg9[%c0_19, %c0_20], %26 {strides = array<i32>} : memref<8x1xf32, #tpu.memory_space<vmem>>, vector<8x1xf32>,
    } else {
    }
    %c0_i32_5 = arith.constant 0 : i32
    %8 = arith.cmpi eq, %arg0, %c0_i32_5 : i32
    %9 = arith.extui %8 : i1 to i32
    %c0_i32_6 = arith.constant 0 : i32
    %10 = arith.cmpi ne, %9, %c0_i32_6 : i32
    scf.if %10 {
      %c0_11 = arith.constant 0 : index
      %c0_12 = arith.constant 0 : index
      %19 = vector.load %arg7[%c0_11, %c0_12] : memref<8x1xf32, #tpu.memory_space<vmem>>, vector<8x1xf32>
      %20 = vector.broadcast %19 : vector<8x1xf32> to vector<8x128xf32>
      %21 = arith.subf %2, %20 : vector<8x128xf32>
      %c0_13 = arith.constant 0 : index
      %c0_14 = arith.constant 0 : index
      %22 = vector.load %arg8[%c0_13, %c0_14] : memref<8x1xf32, #tpu.memory_space<vmem>>, vector<8x1xf32>
      %cst_15 = arith.constant dense<0.000000e+00> : vector<8xf32>
      %23 = vector.multi_reduction <add>, %21, %cst_15 [1] : vector<8x128xf32> to vector<8xf32>
      %24 = vector.shape_cast %23 : vector<8xf32> to vector<8x1xf32>
      %25 = arith.addf %22, %24 : vector<8x1xf32>
      %c0_16 = arith.constant 0 : index
      %c0_17 = arith.constant 0 : index
      %26 = vector.load %arg8[%c0_16, %c0_17] : memref<8x1xf32, #tpu.memory_space<vmem>>, vector<8x1xf32>
      tpu.vector_store %arg8[%c0_16, %c0_17], %25 {strides = array<i32>} : memref<8x1xf32, #tpu.memory_space<vmem>>, vector<8x1xf32>,
      %c0_18 = arith.constant 0 : index
      %c0_19 = arith.constant 0 : index
      %27 = vector.load %arg9[%c0_18, %c0_19] : memref<8x1xf32, #tpu.memory_space<vmem>>, vector<8x1xf32>
      %28 = arith.mulf %21, %21 : vector<8x128xf32>
      %cst_20 = arith.constant dense<0.000000e+00> : vector<8xf32>
      %29 = vector.multi_reduction <add>, %28, %cst_20 [1] : vector<8x128xf32> to vector<8xf32>
      %30 = vector.shape_cast %29 : vector<8xf32> to vector<8x1xf32>
      %31 = arith.addf %27, %30 : vector<8x1xf32>
      %c0_21 = arith.constant 0 : index
      %c0_22 = arith.constant 0 : index
      %32 = vector.load %arg9[%c0_21, %c0_22] : memref<8x1xf32, #tpu.memory_space<vmem>>, vector<8x1xf32>
      tpu.vector_store %arg9[%c0_21, %c0_22], %31 {strides = array<i32>} : memref<8x1xf32, #tpu.memory_space<vmem>>, vector<8x1xf32>,
    } else {
    }
    %c1_i32 = arith.constant 1 : i32
    %11 = arith.cmpi eq, %arg0, %c1_i32 : i32
    %c0_i32_7 = arith.constant 0 : i32
    %12 = arith.cmpi eq, %arg1, %c0_i32_7 : i32
    %13 = arith.andi %11, %12 : i1
    %14 = arith.extui %13 : i1 to i32
    %c0_i32_8 = arith.constant 0 : i32
    %15 = arith.cmpi ne, %14, %c0_i32_8 : i32
    scf.if %15 {
      %c0_11 = arith.constant 0 : index
      %c0_12 = arith.constant 0 : index
      %19 = vector.load %arg8[%c0_11, %c0_12] : memref<8x1xf32, #tpu.memory_space<vmem>>, vector<8x1xf32>
      %cst_13 = arith.constant 0.001953125 : f32
      %20 = vector.broadcast %cst_13 : f32 to vector<8x1xf32>
      %21 = arith.mulf %19, %20 : vector<8x1xf32>
      %c0_14 = arith.constant 0 : index
      %c0_15 = arith.constant 0 : index
      %22 = vector.load %arg7[%c0_14, %c0_15] : memref<8x1xf32, #tpu.memory_space<vmem>>, vector<8x1xf32>
      %23 = arith.addf %22, %21 : vector<8x1xf32>
      %c0_16 = arith.constant 0 : index
      %c0_17 = arith.constant 0 : index
      %24 = vector.load %arg9[%c0_16, %c0_17] : memref<8x1xf32, #tpu.memory_space<vmem>>, vector<8x1xf32>
      %cst_18 = arith.constant 0.001953125 : f32
      %25 = vector.broadcast %cst_18 : f32 to vector<8x1xf32>
      %26 = arith.mulf %24, %25 : vector<8x1xf32>
      %27 = arith.mulf %21, %21 : vector<8x1xf32>
      %28 = arith.subf %26, %27 : vector<8x1xf32>
      %cst_19 = arith.constant 0.000000e+00 : f32
      %29 = vector.broadcast %cst_19 : f32 to vector<8x1xf32>
      %30 = arith.maximumf %28, %29 : vector<8x1xf32>
      %c0_20 = arith.constant 0 : index
      %c0_21 = arith.constant 0 : index
      %31 = vector.load %arg4[%c0_20, %c0_21] : memref<8x1xf32, #tpu.memory_space<vmem>>, vector<8x1xf32>
      %cst_22 = arith.constant 9.99999974E-6 : f32
      %32 = vector.broadcast %cst_22 : f32 to vector<8x1xf32>
      %33 = arith.addf %30, %32 : vector<8x1xf32>
      %34 = math.rsqrt %33 : vector<8x1xf32>
      %35 = arith.mulf %31, %34 : vector<8x1xf32>
      %c0_23 = arith.constant 0 : index
      %c0_24 = arith.constant 0 : index
      %36 = vector.load %arg10[%c0_23, %c0_24] : memref<8x1xf32, #tpu.memory_space<vmem>>, vector<8x1xf32>
      tpu.vector_store %arg10[%c0_23, %c0_24], %35 {strides = array<i32>} : memref<8x1xf32, #tpu.memory_space<vmem>>, vector<8x1xf32>,
      %c0_25 = arith.constant 0 : index
      %c0_26 = arith.constant 0 : index
      %37 = vector.load %arg5[%c0_25, %c0_26] : memref<8x1xf32, #tpu.memory_space<vmem>>, vector<8x1xf32>
      %38 = arith.mulf %23, %35 : vector<8x1xf32>
      %39 = arith.subf %37, %38 : vector<8x1xf32>
      %c0_27 = arith.constant 0 : index
      %c0_28 = arith.constant 0 : index
      %40 = vector.load %arg11[%c0_27, %c0_28] : memref<8x1xf32, #tpu.memory_space<vmem>>, vector<8x1xf32>
      tpu.vector_store %arg11[%c0_27, %c0_28], %39 {strides = array<i32>} : memref<8x1xf32, #tpu.memory_space<vmem>>, vector<8x1xf32>,
    } else {
    }
    %c1_i32_9 = arith.constant 1 : i32
    %16 = arith.cmpi eq, %arg0, %c1_i32_9 : i32
    %17 = arith.extui %16 : i1 to i32
    %c0_i32_10 = arith.constant 0 : i32
    %18 = arith.cmpi ne, %17, %c0_i32_10 : i32
    scf.if %18 {
      %c0_11 = arith.constant 0 : index
      %c0_12 = arith.constant 0 : index
      %19 = vector.load %arg10[%c0_11, %c0_12] : memref<8x1xf32, #tpu.memory_space<vmem>>, vector<8x1xf32>
      %20 = vector.broadcast %19 : vector<8x1xf32> to vector<8x128xf32>
      %21 = arith.mulf %2, %20 : vector<8x128xf32>
      %c0_13 = arith.constant 0 : index
      %c0_14 = arith.constant 0 : index
      %22 = vector.load %arg11[%c0_13, %c0_14] : memref<8x1xf32, #tpu.memory_space<vmem>>, vector<8x1xf32>
      %23 = vector.broadcast %22 : vector<8x1xf32> to vector<8x128xf32>
      %24 = arith.addf %21, %23 : vector<8x128xf32>
      %cst_15 = arith.constant 0.000000e+00 : f32
      %25 = vector.broadcast %cst_15 : f32 to vector<8x128xf32>
      %26 = arith.maximumf %24, %25 : vector<8x128xf32>
      %c0_16 = arith.constant 0 : index
      %c0_17 = arith.constant 0 : index
      %27 = vector.load %arg6[%c0_16, %c0_17] : memref<8x128xf32, #tpu.memory_space<vmem>>, vector<8x128xf32>
      tpu.vector_store %arg6[%c0_16, %c0_17], %26 {strides = array<i32>} : memref<8x128xf32, #tpu.memory_space<vmem>>, vector<8x128xf32>,
    } else {
    }
    return
  }
  func.func @transform_0(%arg0: i32, %arg1: i32) -> (i32, i32) {
    %c0_i32 = arith.constant 0 : i32
    %c0_i32_0 = arith.constant 0 : i32
    return %c0_i32, %arg1 : i32, i32
  }
  func.func @transform_1(%arg0: i32, %arg1: i32) -> (i32, i32) {
    %c0_i32 = arith.constant 0 : i32
    %c0_i32_0 = arith.constant 0 : i32
    %c0_i32_1 = arith.constant 0 : i32
    return %c0_i32, %c0_i32_0 : i32, i32
  }
  func.func @transform_2(%arg0: i32, %arg1: i32) -> (i32, i32) {
    %c0_i32 = arith.constant 0 : i32
    %c0_i32_0 = arith.constant 0 : i32
    %c0_i32_1 = arith.constant 0 : i32
    return %c0_i32, %c0_i32_0 : i32, i32
  }
  func.func @transform_3(%arg0: i32, %arg1: i32) -> (i32, i32) {
    %c0_i32 = arith.constant 0 : i32
    %c0_i32_0 = arith.constant 0 : i32
    %c0_i32_1 = arith.constant 0 : i32
    return %c0_i32, %c0_i32_0 : i32, i32
  }
  func.func @transform_4(%arg0: i32, %arg1: i32) -> (i32, i32) {
    %0 = arith.muli %arg1, %arg0 : i32
    %c0_i32 = arith.constant 0 : i32
    %c0_i32_0 = arith.constant 0 : i32
    return %c0_i32, %0 : i32, i32
  }
}

</mosaic_0001>

<bundles_post_ra>
// kernel: conv_bn_relu.1
= control target key start
LH: loop header
LB: loop body
LE: loop exit
PB: predicated region body
PF: predicated region fallthrough
CT: control target
= control target key end

     0   :  { %s683_s15 = smov 0   ;;  %s685_s16 = smov 0   ;;  %s795_s0 = inlined_call_operand.vmem [shape: bf16[48,512], index: 0, kind: input, shape index: {}]   ;;  %s796_s1 = inlined_call_operand.vmem [shape: bf16[8,48], index: 1, kind: input, shape index: {}]   ;;  %s797_s2 = inlined_call_operand.vmem [shape: f32[8,1], index: 2, kind: input, shape index: {}]   ;;  %s798_s3 = inlined_call_operand.vmem [shape: f32[8,1], index: 3, kind: input, shape index: {}]   ;;  %s799_s4 = inlined_call_operand.vmem [shape: f32[8,512], index: 4, kind: output, shape index: {}]  }
   0x1   :  { %s687_s17 = smov 0   ;;  %s689_s18 = smov 0  }
   0x2   :  { %s691_s19 = smov 0   ;;  %s693_s20 = smov 0  }
   0x3   :  { %s695_s21 = smov 0  }
   0x4 LB: > { %s23_s22 = sadd.s32 1, %s643_s19  ;;  %s26_s23 = sadd.s32 1, %s647_s20  ;;  %s651_s21 = sphi %s695_s21, %s14_s21   ;;  %s647_s20 = sphi %s693_s20, %s805_s20   ;;  %s643_s19 = sphi %s691_s19, %s804_s19   ;;  %s639_s18 = sphi %s689_s18, %s803_s18   ;;  %s635_s17 = sphi %s687_s17, %s802_s17   ;;  %s631_s16 = sphi %s685_s16, %s801_s16   ;;  %s627_s15 = sphi %s683_s15, %s800_s15  }
   0x5   : > { %p24_p0 = scmp.ge.s32.totalorder %s23_s22, 4  ;;  %s33_s24 = sadd.s32 1, %s631_s16 }
   0x6   : > { %p40_p1 = scmp.ne.s32.totalorder %s631_s16, %s627_s15  ;;  %p41_p2 = scmp.eq.s32.totalorder %s651_s21, 0 }
   0x7   : > { %s807_s22 = smov (%p24_p0, %s23_s22), 0  ;;  %s809_s23 = smov (!%p24_p0, %s26_s23), %s647_s20 }
   0x8   : > { %s30_s25 = ssub.s32 %s643_s19, %s807_s22  ;;  %p42_p3 = por %p41_p2, %p40_p1 }
   0x9   : > { %p28_p4 = scmp.ge.s32.totalorder %s809_s23, 2  ;;  %p31_p5 = scmp.eq.s32.totalorder %s30_s25, 0 }
   0xa   : > { %p501_p6 = scmp.ge.s32.totalorder %s651_s21, 8 }
   0xb   : > { %s811_s23 = smov (%p28_p4, %s809_s23), 0 }
   0xc   : > { %s732_s26 = scalar_select %p31_p5, %s631_s16, %s33_s24  }
   0xd   : > { %166 = sbr.rel (%p501_p6) target bundleno = 26 (0x1a), region = 28 }
  0x12   : > { %169 = sbr.rel (!%p42_p3) target bundleno = 26 (0x1a), region = 32  ;;  %s171_s27 = sand.u32 (%p42_p3), 1, %s631_s16  }
  0x13   : > { %s502_s28 = sshll.u32 (%p42_p3), %s643_s19, 2  ;;  %s527_s29 = smul.u32 (%p42_p3), 24, %s171_s27 }
  0x14   : > { %s175_s6 = scalar_lea.vmem (%p42_p3), %s795_s0, %s502_s28 }
  0x15   : > { %v192_v0 = vld [vmem:[%s175_s6] sm:$0xf] (%p42_p3)  ;;  %v194_v1 = vld [vmem:[%s175_s6 + $0x10] sm:$0xf] (%p42_p3)  ;;  %s173_s7 = scalar_lea.vmem (%p42_p3), [#allocation7], %s527_s29 }
  0x16   : > { %v196_v2 = vld [vmem:[%s175_s6 + $0x20] sm:$0xf] (%p42_p3)  ;;  %v198_v3 = vld [vmem:[%s175_s6 + $0x30] sm:$0xf] (%p42_p3)  ;;  %193 = vst [vmem:[%s173_s7] sm:$0xf] (%p42_p3), %v192_v0 }
  0x17   : > { %v200_v4 = vld [vmem:[%s175_s6 + $0x40] sm:$0xf]  ;;  %195 = vst [vmem:[%s173_s7 + $0x4] sm:$0xf] %v194_v1  ;;  %197 = vst [vmem:[%s173_s7 + $0x8] sm:$0xf] %v196_v2 }
  0x18   : > { %199 = vst [vmem:[%s173_s7 + $0xc] sm:$0xf] %v198_v3  ;;  %201 = vst [vmem:[%s173_s7 + $0x10] sm:$0xf] %v200_v4  ;;  %v202_v5 = vld [vmem:[%s175_s6 + $0x50] sm:$0xf] }
  0x19   : > { %203 = vst [vmem:[%s173_s7 + $0x14] sm:$0xf] %v202_v5 }
  0x1a PF: > { %p503_p7 = scmp.ge.s32.totalorder %s651_s21, 1  ;;  %p238_p8 = scmp.lt.s32.totalorder %s651_s21, 9 }
  0x1c   : > { %p239_p9 = pnand %p503_p7, %p238_p8 }
  0x1d   : > { %s270_s8 = smul.u32 (!%p239_p9), %s635_s17, %s639_s18  ;;  %s245_s9 = sand.u32 (!%p239_p9), 1, %s627_s15  }
  0x1e   : > { %242 = sbr.rel (%p239_p9) target bundleno = 849 (0x351), region = 73  ;;  %p346_p11 = scmp.eq.s32.totalorder (!%p239_p9), %s639_s18, 0 }
  0x1f   : > { %s528_s10 = smul.u32 (!%p239_p9), 24, %s245_s9  ;;  %p271_p10 = scmp.lt.s32.totalorder (!%p239_p9), %s270_s8, 3 }
  0x20   : > { %p347_p12 = scmp.eq.s32.totalorder (!%p239_p9), %s635_s17, 0 }
  0x21   : > { %s247_s11 = scalar_lea.vmem (!%p239_p9), [#allocation7], %s528_s10 }
  0x22   : > { %p348_p13 = pnand (!%p239_p9), %p347_p12, %p346_p11 }
  0x23   : > { %v653_v6 = vmov 0.0   ;;  %vm654_vm0 = vmmov 0   ;;  %s813_s8 = smov (!%p271_p10, %s270_s8), 3  ;;  %v590_v7 = vld [vmem:[%s247_s11 + $0x10] sm:$0xff]   ;;  %v591_v8 = vld [vmem:[%s247_s11 + $0x8] sm:$0xff]   ;;  %v592_v9 = vld [vmem:[%s247_s11] sm:$0xff]  }
  0x24   : > { %517 = vmatprep.subr.bf16.mxu0 %v653_v6  ;;  %523 = vmatprep.mubr.msk.bf16.mxu0 %vm654_vm0, %v653_v6  ;;  %s504_s12 = sshll.u32 %s813_s8, 3  ;;  %v277_v10 = vld [vmem:[%s796_s1] sm:$0xf]  ;;  %vm302_vm1 = vcmask 392192  }
  0x25   : > { %518 = vmatpush3.bf16.msra.mxu0 %v590_v7  ;;  %s748_s24 = scalar_lea.vmem %s799_s4, %s504_s12 }
  0x26   : > { %519 = vmatprep.subr.bf16.mxu0 %v653_v6 }
  0x29   : > { %520 = vmatpush3.bf16.msra.mxu0 %v591_v8 }
  0x2a   : > { %521 = vmatprep.subr.bf16.mxu0 %v653_v6 }
  0x2d   : > { %522 = vmatpush3.bf16.msra.mxu0 %v592_v9 }
  0x30   : > { %524 = vmatmul.mubr.msk.bf16.vlgmr.msra.gmra.mxu0 %vm302_vm1, %v277_v10 }
  0xf0   : > { %v757_v11 = vpop.f32.mrf.mxu0 }
  0xf2   : > { %v525_v12 = vpop.f32.mrf.mxu0  ;;  %351 = sbr.rel (%p348_p13) target bundleno = 388 (0x184), region = 81 }
  0xf4   : > { %v343_v13 = vpop.f32.mrf.mxu0 }
  0xf6   : > { %v526_v14 = vpop.f32.mrf.mxu0 }
  0xf7   : > { %352 = vadd.xlane.f32.xlu0 %v757_v11  ;;  %vm355_vm2 = vcmask 7168   ;;  %v655_v15 = vmov 0.0  }
  0xf8   : > { %357 = vst.msk [vmem:[#allocation3] sm:$0xff] %vm355_vm2, %v655_v15  ;;  %358 = vst.msk [vmem:[#allocation4] sm:$0xff] %vm355_vm2, %v655_v15 }
 0x180   : > { %v353_v16 = vpop.xlane.xlu0 %352 }
 0x181   : > { %v354_v17 = vmul.f32 0.0078125, %v353_v16 }
 0x183   : > { %356 = vst.msk [vmem:[#allocation2] sm:$0xff] %vm355_vm2, %v354_v17 }
 0x184 PF: > { %p509_p0 = scmp.ne.s32.totalorder %s639_s18, 0 }
 0x186   : > { %361 = sbr.rel (%p509_p0) target bundleno = 666 (0x29a), region = 85 }
 0x18b   : > { %v362_v18 = vld [vmem:[#allocation2] sm:$0xff]  ;;  %v656_v19 = vmov 0   ;;  %v369_v23 = vld [vmem:[#allocation3] sm:$0xff]  ;;  %vm373_vm3 = vcmask 7168   ;;  %v375_v25 = vld [vmem:[#allocation4] sm:$0xff] }
 0x18c   : > { %593 = vset.pattern.permute.xlu0 %v656_v19 }
 0x18d   : > { %365 = vperm.xlu0 %593, %v362_v18  }
 0x208   : > { %v366_v20 = vpop.permute.xlu0 %365 }
 0x209   : > { %v368_v21 = vsub.f32 %v757_v11, %v366_v20 }
 0x20b   : > { %370 = vadd.xlane.f32.xlu0 %v368_v21  ;;  %v376_v22 = vmul.f32 %v368_v21, %v368_v21 }
 0x20d   : > { %377 = vadd.xlane.f32.xlu1 %v376_v22 }
 0x294   : > { %v371_v24 = vpop.xlane.xlu0 %370 }
 0x295   : > { %v372_v26 = vadd.f32 %v371_v24, %v369_v23 }
 0x296   : > { %v378_v27 = vpop.xlane.xlu1 %377 }
 0x297   : > { %374 = vst.msk [vmem:[#allocation3] sm:$0xff] %vm373_vm3, %v372_v26  ;;  %v379_v28 = vadd.f32 %v378_v27, %v375_v25 }
 0x299   : > { %380 = vst.msk [vmem:[#allocation4] sm:$0xff] %vm373_vm3, %v379_v28 }
 0x29a PF: > { %p381_p1 = scmp.eq.s32.totalorder %s639_s18, 1 }
 0x29c   : > { %p382_p2 = pnand %p381_p1, %p347_p12 }
 0x29e   : > { %385 = sbr.rel (%p382_p2) target bundleno = 707 (0x2c3), region = 89 }
 0x2a3   : > { %v386_v29 = vld [vmem:[#allocation3] sm:$0xff]  ;;  %v390_v30 = vld [vmem:[#allocation4] sm:$0xff]  ;;  %v388_v37 = vld [vmem:[#allocation2] sm:$0xff]  ;;  %vm399_vm4 = vcmask 7168  }
 0x2a4   : > { %v387_v31 = vmul.f32 0.001953125, %v386_v29  ;;  %v391_v32 = vmul.f32 0.001953125, %v390_v30  ;;  %v395_v38 = vld [vmem:[%s797_s2] sm:$0xff] }
 0x2a5   : > { %v401_v42 = vld [vmem:[%s798_s3] sm:$0xff] }
 0x2a6   : > { %v392_v33 = vmul.f32 %v387_v31, %v387_v31  ;;  %v389_v39 = vadd.f32 %v388_v37, %v387_v31 }
 0x2a8   : > { %v393_v34 = vsub.f32 %v391_v32, %v392_v33 }
 0x2aa   : > { %v394_v35 = vmax.f32 %v393_v34, 0.0 }
 0x2ac   : > { %v396_v36 = vadd.f32 1e-05, %v394_v35 }
 0x2ae   : > { %594 = vrsqrt.f32 %v396_v36 }
 0x2bb   : > { %v595_v40 = vpop.eup %594 }
 0x2bc   : > { %v398_v41 = vmul.f32 %v595_v40, %v395_v38 }
 0x2be   : > { %400 = vst.msk [vmem:[#allocation5] sm:$0xff] %vm399_vm4, %v398_v41  ;;  %v402_v43 = vmul.f32 %v398_v41, %v389_v39 }
 0x2c0   : > { %v403_v44 = vsub.f32 %v401_v42, %v402_v43 }
 0x2c2   : > { %404 = vst.msk [vmem:[#allocation6] sm:$0xff] %vm399_vm4, %v403_v44 }
 0x2c3 PF: > { %p510_p3 = scmp.ne.s32.totalorder %s639_s18, 1 }
 0x2c5   : > { %407 = sbr.rel (%p510_p3) target bundleno = 849 (0x351), region = 93 }
 0x2ca   : > { %v408_v45 = vld [vmem:[#allocation5] sm:$0xff]  ;;  %v657_v46 = vmov 0   ;;  %v415_v47 = vld [vmem:[#allocation6] sm:$0xff] }
 0x2cb   : > { %596 = vset.pattern.permute.xlu0 %v657_v46 }
 0x2cc   : > { %411 = vperm.xlu0 %596, %v408_v45  }
 0x2d0   : > { %418 = vperm.xlu0 %596, %v415_v47  }
 0x347   : > { %v412_v48 = vpop.permute.xlu0 %411 }
 0x348   : > { %v414_v49 = vmul.f32 %v412_v48, %v757_v11 }
 0x34b   : > { %v419_v50 = vpop.permute.xlu0 %418 }
 0x34c   : > { %v421_v51 = vadd.f32 %v419_v50, %v414_v49 }
 0x34e   : > { %v422_v52 = vmax.f32 %v421_v51, 0.0 }
 0x350   : > { %423 = vst [vmem:[%s748_s24] sm:$0xff] %v422_v52 }
 0x351 PF: > { %s14_s21 = sadd.s32 1, %s651_s21   ;;  %s800_s15 = smov %s631_s16 }
 0x352   : > { %p11_p4 = scmp.ge.s32.totalorder %s14_s21, 10   ;;  %s801_s16 = smov %s732_s26 }
 0x353   : > { %s802_s17 = smov %s643_s19  ;;  %s803_s18 = smov %s647_s20 }
 0x354   : > { %s804_s19 = smov %s807_s22  ;;  %s805_s20 = smov %s811_s23 }
 0x355   :  { %13 = sbr.rel (!%p11_p4) target bundleno = 4 (0x4), region = 128 }

</bundles_post_ra>
